<compile_context>
chip_gen: v5e
topology: v5e:2x2
jax: 0.10.0
libtpu: 0.0.40
codegen_flags: <defaults>
</compile_context>

<pallas_src>
import functools

import jax
import jax.numpy as jnp
from jax.experimental import pallas as pl
from jax.experimental.pallas import tpu as pltpu


# ---------------------------------------------------------------------------
# Kernel
# ---------------------------------------------------------------------------
def _mlp_res_kernel(x_ref, w1_ref, t1_ref, w2_ref, t2_ref, o_ref, y1_ref):
    """out = x + relu(relu(x @ W1' + t1') @ W2'[:, jtile] + t2'[jtile]).

    BN (eval) scale and the Linear bias are pre-folded into (W', t') by the
    wrapper.  Grid = (row tiles, output-column tiles); y1 is computed once per
    row tile (j == 0) into VMEM scratch and reused for every column tile.
    """
    j = pl.program_id(1)
    mxu_dtype = w1_ref.dtype  # bf16 (default) or f32

    @pl.when(j == 0)
    def _():
        y = jnp.dot(x_ref[...].astype(mxu_dtype), w1_ref[...],
                    preferred_element_type=jnp.float32)
        y = jnp.maximum(y + t1_ref[...], 0.0)          # folded BN1 + ReLU
        y1_ref[...] = y.astype(y1_ref.dtype)           # dropout (eval) = id

    tn = o_ref.shape[-1]
    y2 = jnp.dot(y1_ref[...], w2_ref[...], preferred_element_type=jnp.float32)
    y2 = jnp.maximum(y2 + t2_ref[...], 0.0)            # folded BN2 + ReLU
    col0 = pl.multiple_of(j * tn, tn)
    o_ref[...] = x_ref[:, pl.ds(col0, tn)] + y2        # residual (f32)


# ---------------------------------------------------------------------------
# Helpers
# ---------------------------------------------------------------------------
def _fold_layer(w, b, gamma, beta, mean, var, eps, weights_dtype, d_pad):
    """Fold eval-mode BatchNorm1d + Linear bias into (W', t'); zero-pad to d_pad."""
    s = gamma / jnp.sqrt(var + eps)                        # (D,)
    w_folded = (w.T * s[None, :]).astype(weights_dtype)    # (D_in, D_out)
    t = (b * s + beta - mean * s).reshape(1, -1).astype(jnp.float32)
    d = w_folded.shape[0]
    if d_pad != d:
        w_folded = jnp.pad(w_folded, ((0, d_pad - d), (0, d_pad - d)))
        t = jnp.pad(t, ((0, 0), (0, d_pad - d)))
    return w_folded, t


@functools.lru_cache(maxsize=None)
def _vmem_capacity_bytes() -> int:
    """Per-core VMEM capacity (generation-aware)."""
    try:
        return int(pltpu.get_tpu_info().vmem_capacity_bytes)
    except Exception:  # hardware-info probe only; fall back to smallest (v7x)
        return 64 * 1024 * 1024


@functools.lru_cache(maxsize=None)
def _single_buffer_supported() -> bool:
    """One-time capability probe for pl.Buffered(1) on constant-index specs."""
    def _k(x_ref, o_ref):
        o_ref[...] = x_ref[...]
    try:
        spec = pl.BlockSpec((8, 128), lambda i: (0, 0),
                            pipeline_mode=pl.Buffered(1))
        f = pl.pallas_call(
            _k,
            out_shape=jax.ShapeDtypeStruct((8, 128), jnp.float32),
            grid=(1,),
            in_specs=[spec],
            out_specs=pl.BlockSpec((8, 128), lambda i: (0, 0)),
        )
        jax.block_until_ready(f(jnp.zeros((8, 128), jnp.float32)))
        return True
    except Exception:  # feature probe only; never masks the real kernel build
        return False


def _working_set_bytes(bn, dp, tn, n_col, w_itemsize, single_ok):
    """Resident-VMEM estimate per core (weights + pipelined tiles + scratch)."""
    cbuf = 1 if single_ok else 2           # constant-index specs
    w2buf = cbuf if n_col == 1 else 2      # W2/t2 vary with j when column-tiled
    return (dp * dp * w_itemsize * cbuf            # W1'
            + dp * tn * w_itemsize * w2buf         # W2' tile(s)
            + 8 * dp * 4 * cbuf                    # t1' (sublane-padded)
            + 8 * tn * 4 * w2buf                   # t2'
            + bn * dp * 4 * 2                      # x row tiles (double-buffered)
            + bn * tn * 4 * 2                      # output tiles
            + bn * dp * w_itemsize)                # y1 scratch


# ---------------------------------------------------------------------------
# Wrapper
# ---------------------------------------------------------------------------
def my_linear_simple(x, params, *, block_n=1024, weights_dtype=jnp.bfloat16,
                     eps=1e-5):
    """Fused eval-mode forward of MyLinearSimple.

    x: (N, D) float32; params use PyTorch conventions (w is (D_out, D_in)).

    Note: with the default weights_dtype=bf16 both the weights *and* the MXU
    activation operands are bf16 (accumulation stays f32).  Pass
    weights_dtype=jnp.float32 for a bit-accurate (slower) path.
    """
    N, D = x.shape
    w_itemsize = jnp.dtype(weights_dtype).itemsize

    # Lane-dense feature dim: pad D to a multiple of 128 (zero-padded weight
    # columns => padded output columns are exactly zero, sliced off at the end).
    Dp = ((D + 127) // 128) * 128
    x_p = jnp.pad(x, ((0, 0), (0, Dp - D))) if Dp != D else x

    w1f, t1 = _fold_layer(params["w1"], params["b1"], params["gamma1"],
                          params["beta1"], params["mean1"], params["var1"],
                          eps, weights_dtype, Dp)
    w2f, t2 = _fold_layer(params["w2"], params["b2"], params["gamma2"],
                          params["beta2"], params["mean2"], params["var2"],
                          eps, weights_dtype, Dp)

    # Row tile: big for v5e/v6e HBM roofline, but keep >= 4 row steps when the
    # batch allows (>= 2 per v7x TensorCore so the DMA prologue is hidden).
    pack = (8 * 4) // w_itemsize            # 8 rows for f32, 16 for bf16
    bn = min(block_n, N)
    if N >= 4 * 128:
        bn = min(bn, max(128, -(-N // 4)))
    bn = max(pack, -(-bn // pack) * pack)

    single_ok = _single_buffer_supported()
    vmem_cap = _vmem_capacity_bytes()

    # Column-tile W2 when two resident DxD weights stop fitting the budget
    # (v7x 64 MiB: roughly D >= ~2048 f32 / ~2900 bf16).
    tn, n_col = Dp, 1
    if _working_set_bytes(bn, Dp, Dp, 1, w_itemsize, single_ok) > 0.45 * vmem_cap:
        for cand in (1024, 512, 256, 128):
            if Dp % cand == 0:
                tn = cand
                break
        n_col = Dp // tn
    # TODO(synk): for extreme D where even W1' alone exceeds VMEM, also tile
    #             the first matmul's output / contraction dimension.

    need = _working_set_bytes(bn, Dp, tn, n_col, w_itemsize, single_ok)
    vmem_limit = int(min(max(int(1.5 * need), 16 * 2**20), int(0.9 * vmem_cap)))
    vmem_limit = max(vmem_limit, min(need, vmem_cap))  # never below the need

    const_kw = {"pipeline_mode": pl.Buffered(1)} if single_ok else {}
    row_in_spec = pl.BlockSpec((bn, Dp), lambda i, j: (i, 0))
    w1_spec = pl.BlockSpec((Dp, Dp), lambda i, j: (0, 0), **const_kw)
    t1_spec = pl.BlockSpec((1, Dp), lambda i, j: (0, 0), **const_kw)
    if n_col == 1:
        w2_spec = pl.BlockSpec((Dp, tn), lambda i, j: (0, 0), **const_kw)
        t2_spec = pl.BlockSpec((1, tn), lambda i, j: (0, 0), **const_kw)
    else:
        w2_spec = pl.BlockSpec((Dp, tn), lambda i, j: (0, j))
        t2_spec = pl.BlockSpec((1, tn), lambda i, j: (0, j))
    out_spec = pl.BlockSpec((bn, tn), lambda i, j: (i, j))

    grid = (pl.cdiv(N, bn), n_col)

    cost = pl.CostEstimate(
        flops=2 * 2 * N * Dp * Dp,
        transcendentals=0,
        bytes_accessed=(2 * N * Dp * 4               # x in + out
                        + 2 * Dp * Dp * w_itemsize   # weights
                        + 2 * Dp * 4),               # shifts
    )

    out = pl.pallas_call(
        _mlp_res_kernel,
        out_shape=jax.ShapeDtypeStruct((N, Dp), jnp.float32),
        grid_spec=pltpu.PrefetchScalarGridSpec(
            num_scalar_prefetch=0,
            grid=grid,
            in_specs=[row_in_spec, w1_spec, t1_spec, w2_spec, t2_spec],
            out_specs=out_spec,
            scratch_shapes=[pltpu.VMEM((bn, Dp), weights_dtype)],
        ),
        compiler_params=pltpu.CompilerParams(
            dimension_semantics=("parallel", "arbitrary"),
            vmem_limit_bytes=vmem_limit),
        cost_estimate=cost,
    )(x_p, w1f, t1, w2f, t2)

    return out[:, :D] if Dp != D else out


# ---------------------------------------------------------------------------
# Demo / correctness check
# ---------------------------------------------------------------------------
def init_params(key, D):
    ks = jax.random.split(key, 12)
    bound = 1.0 / jnp.sqrt(D)
    u = lambda k, s: jax.random.uniform(k, s, jnp.float32, -bound, bound)
    return {
        # nn.Linear default init: uniform(-1/sqrt(fan_in), 1/sqrt(fan_in))
        "w1": u(ks[0], (D, D)), "b1": u(ks[1], (D,)),
        "w2": u(ks[2], (D, D)), "b2": u(ks[3], (D,)),
        # non-trivial BN running stats so the BN/bias folding is exercised
        "gamma1": 1.0 + 0.1 * jax.random.normal(ks[4], (D,), jnp.float32),
        "beta1": 0.1 * jax.random.normal(ks[5], (D,), jnp.float32),
        "mean1": 0.1 * jax.random.normal(ks[6], (D,), jnp.float32),
        "var1": 1.0 + 0.25 * jax.random.uniform(ks[7], (D,), jnp.float32),
        "gamma2": 1.0 + 0.1 * jax.random.normal(ks[8], (D,), jnp.float32),
        "beta2": 0.1 * jax.random.normal(ks[9], (D,), jnp.float32),
        "mean2": 0.1 * jax.random.normal(ks[10], (D,), jnp.float32),
        "var2": 1.0 + 0.25 * jax.random.uniform(ks[11], (D,), jnp.float32),
    }


def reference(x, params, eps=1e-5):
    """Pure-JAX reference matching PyTorch eval-mode forward."""
    def bn(y, g, b, m, v):
        return (y - m) / jnp.sqrt(v + eps) * g + b
    y = x @ params["w1"].T + params["b1"]
    y = jnp.maximum(bn(y, params["gamma1"], params["beta1"],
                       params["mean1"], params["var1"]), 0.0)
    y = y @ params["w2"].T + params["b2"]
    y = jnp.maximum(bn(y, params["gamma2"], params["beta2"],
                       params["mean2"], params["var2"]), 0.0)
    return x + y


if __name__ == "__main__":
    key = jax.random.PRNGKey(0)
    k_x, k_p = jax.random.split(key)

    # linear_size = 128; N = 512 gives a 4-step "parallel" row grid
    # (>= 2 steps per TensorCore on v7x) with 128-row tiles.
    N, D = 512, 128
    x = jax.random.normal(k_x, (N, D), jnp.float32)
    params = init_params(k_p, D)
    ref = reference(x, params)

    # Default path: bf16 MXU operands, f32 accumulation.
    out = jax.block_until_ready(my_linear_simple(x, params))
    assert out.shape == (N, D)
    assert jnp.allclose(out, ref, atol=5e-2, rtol=5e-2), "bf16 mismatch vs reference"

    # f32 path: bit-accurate check.
    out_f32 = jax.block_until_ready(
        my_linear_simple(x, params, weights_dtype=jnp.float32))
    assert jnp.allclose(out_f32, ref, atol=1e-4, rtol=1e-4), "f32 mismatch vs reference"

    print("KERNEL_OK")
</pallas_src>

<mosaic_0001>
module attributes {stable_mosaic.version = 11 : i64} {
  func.func @_k(%arg0: i32, %arg1: memref<8x128xf32, #tpu.memory_space<vmem>>, %arg2: memref<8x128xf32, #tpu.memory_space<vmem>>) attributes {dimension_semantics = [#tpu.dimension_semantics<arbitrary>], iteration_bounds = array<i64: 1>, scalar_prefetch = 0 : i64, scratch_operands = 0 : i64, tpu.core_type = #tpu.core_type<tc>, window_params = [{pipeline_mode = #tpu.pipeline_mode<synchronous>, transform_indices = @transform_0, window_bounds = array<i64: 8, 128>}, {pipeline_mode = #tpu.pipeline_mode<synchronous>, transform_indices = @transform_1, window_bounds = array<i64: 8, 128>}]} {
    %c0 = arith.constant 0 : index
    %c0_0 = arith.constant 0 : index
    %0 = vector.load %arg1[%c0, %c0_0] : memref<8x128xf32, #tpu.memory_space<vmem>>, vector<8x128xf32>
    %c0_1 = arith.constant 0 : index
    %c0_2 = arith.constant 0 : index
    %1 = vector.load %arg2[%c0_1, %c0_2] : memref<8x128xf32, #tpu.memory_space<vmem>>, vector<8x128xf32>
    tpu.vector_store %arg2[%c0_1, %c0_2], %0 {strides = array<i32>} : memref<8x128xf32, #tpu.memory_space<vmem>>, vector<8x128xf32>,
    return
  }
  func.func @transform_0(%arg0: i32) -> (i32, i32) {
    %c0_i32 = arith.constant 0 : i32
    %c0_i32_0 = arith.constant 0 : i32
    %c0_i32_1 = arith.constant 0 : i32
    return %c0_i32, %c0_i32_0 : i32, i32
  }
  func.func @transform_1(%arg0: i32) -> (i32, i32) {
    %c0_i32 = arith.constant 0 : i32
    %c0_i32_0 = arith.constant 0 : i32
    %c0_i32_1 = arith.constant 0 : i32
    return %c0_i32, %c0_i32_0 : i32, i32
  }
}

module attributes {stable_mosaic.version = 11 : i64} {
  func.func @_mlp_res_kernel(%arg0: i32, %arg1: i32, %arg2: memref<128x128xf32, #tpu.memory_space<vmem>>, %arg3: memref<128x128xbf16, #tpu.memory_space<vmem>>, %arg4: memref<1x128xf32, #tpu.memory_space<vmem>>, %arg5: memref<128x128xbf16, #tpu.memory_space<vmem>>, %arg6: memref<1x128xf32, #tpu.memory_space<vmem>>, %arg7: memref<128x128xf32, #tpu.memory_space<vmem>>, %arg8: memref<128x128xbf16, #tpu.memory_space<vmem>>) attributes {dimension_semantics = [#tpu.dimension_semantics<parallel>, #tpu.dimension_semantics<arbitrary>], iteration_bounds = array<i64: 4, 1>, scalar_prefetch = 0 : i64, scratch_operands = 1 : i64, tpu.core_type = #tpu.core_type<tc>, window_params = [{transform_indices = @transform_0, window_bounds = array<i64: 128, 128>}, {pipeline_mode = #tpu.pipeline_mode<synchronous>, transform_indices = @transform_1, window_bounds = array<i64: 128, 128>}, {pipeline_mode = #tpu.pipeline_mode<synchronous>, transform_indices = @transform_2, window_bounds = array<i64: 1, 128>}, {pipeline_mode = #tpu.pipeline_mode<synchronous>, transform_indices = @transform_3, window_bounds = array<i64: 128, 128>}, {pipeline_mode = #tpu.pipeline_mode<synchronous>, transform_indices = @transform_4, window_bounds = array<i64: 1, 128>}, {transform_indices = @transform_5, window_bounds = array<i64: 128, 128>}]} {
    %c0_i32 = arith.constant 0 : i32
    %0 = arith.cmpi eq, %arg1, %c0_i32 : i32
    %1 = arith.extui %0 : i1 to i32
    %c0_i32_0 = arith.constant 0 : i32
    %2 = arith.cmpi ne, %1, %c0_i32_0 : i32
    scf.if %2 {
      %c0_10 = arith.constant 0 : index
      %c0_11 = arith.constant 0 : index
      %17 = vector.load %arg2[%c0_10, %c0_11] : memref<128x128xf32, #tpu.memory_space<vmem>>, vector<128x128xf32>
      %18 = arith.truncf %17 : vector<128x128xf32> to vector<128x128xbf16>
      %c0_12 = arith.constant 0 : index
      %c0_13 = arith.constant 0 : index
      %19 = vector.load %arg3[%c0_12, %c0_13] : memref<128x128xbf16, #tpu.memory_space<vmem>>, vector<128x128xbf16>
      %cst_14 = arith.constant dense<0.000000e+00> : vector<128x128xf32>
      %20 = tpu.matmul %18, %19, %cst_14 {dimension_numbers = #tpu.dot_dimension_numbers<[1], [0], [0], [1], [0, 0, 1, 1], [], []>} : vector<128x128xbf16>, vector<128x128xbf16>, vector<128x128xf32> -> vector<128x128xf32>
      %c0_15 = arith.constant 0 : index
      %c0_16 = arith.constant 0 : index
      %21 = vector.load %arg4[%c0_15, %c0_16] : memref<1x128xf32, #tpu.memory_space<vmem>>, vector<1x128xf32>
      %22 = vector.broadcast %21 : vector<1x128xf32> to vector<128x128xf32>
      %23 = arith.addf %20, %22 : vector<128x128xf32>
      %cst_17 = arith.constant 0.000000e+00 : f32
      %24 = vector.broadcast %cst_17 : f32 to vector<128x128xf32>
      %25 = arith.maximumf %23, %24 : vector<128x128xf32>
      %26 = arith.truncf %25 : vector<128x128xf32> to vector<128x128xbf16>
      %c0_18 = arith.constant 0 : index
      %c0_19 = arith.constant 0 : index
      %27 = vector.load %arg8[%c0_18, %c0_19] : memref<128x128xbf16, #tpu.memory_space<vmem>>, vector<128x128xbf16>
      tpu.vector_store %arg8[%c0_18, %c0_19], %26 {strides = array<i32>} : memref<128x128xbf16, #tpu.memory_space<vmem>>, vector<128x128xbf16>,
    } else {
    }
    %c0 = arith.constant 0 : index
    %c0_1 = arith.constant 0 : index
    %3 = vector.load %arg8[%c0, %c0_1] : memref<128x128xbf16, #tpu.memory_space<vmem>>, vector<128x128xbf16>
    %c0_2 = arith.constant 0 : index
    %c0_3 = arith.constant 0 : index
    %4 = vector.load %arg5[%c0_2, %c0_3] : memref<128x128xbf16, #tpu.memory_space<vmem>>, vector<128x128xbf16>
    %cst = arith.constant dense<0.000000e+00> : vector<128x128xf32>
    %5 = tpu.matmul %3, %4, %cst {dimension_numbers = #tpu.dot_dimension_numbers<[1], [0], [0], [1], [0, 0, 1, 1], [], []>} : vector<128x128xbf16>, vector<128x128xbf16>, vector<128x128xf32> -> vector<128x128xf32>
    %c0_4 = arith.constant 0 : index
    %c0_5 = arith.constant 0 : index
    %6 = vector.load %arg6[%c0_4, %c0_5] : memref<1x128xf32, #tpu.memory_space<vmem>>, vector<1x128xf32>
    %7 = vector.broadcast %6 : vector<1x128xf32> to vector<128x128xf32>
    %8 = arith.addf %5, %7 : vector<128x128xf32>
    %cst_6 = arith.constant 0.000000e+00 : f32
    %9 = vector.broadcast %cst_6 : f32 to vector<128x128xf32>
    %10 = arith.maximumf %8, %9 : vector<128x128xf32>
    %c128_i32 = arith.constant 128 : i32
    %11 = arith.muli %arg1, %c128_i32 : i32
    %12 = tpu.assume_multiple %11, 128 : i32
    %c0_7 = arith.constant 0 : index
    %13 = arith.index_cast %12 : i32 to index
    %14 = vector.load %arg2[%c0_7, %13] : memref<128x128xf32, #tpu.memory_space<vmem>>, vector<128x128xf32>
    %15 = arith.addf %14, %10 : vector<128x128xf32>
    %c0_8 = arith.constant 0 : index
    %c0_9 = arith.constant 0 : index
    %16 = vector.load %arg7[%c0_8, %c0_9] : memref<128x128xf32, #tpu.memory_space<vmem>>, vector<128x128xf32>
    tpu.vector_store %arg7[%c0_8, %c0_9], %15 {strides = array<i32>} : memref<128x128xf32, #tpu.memory_space<vmem>>, vector<128x128xf32>,
    return
  }
  func.func @transform_0(%arg0: i32, %arg1: i32) -> (i32, i32) {
    %c0_i32 = arith.constant 0 : i32
    %c0_i32_0 = arith.constant 0 : i32
    return %arg0, %c0_i32 : i32, i32
  }
  func.func @transform_1(%arg0: i32, %arg1: i32) -> (i32, i32) {
    %c0_i32 = arith.constant 0 : i32
    %c0_i32_0 = arith.constant 0 : i32
    %c0_i32_1 = arith.constant 0 : i32
    return %c0_i32, %c0_i32_0 : i32, i32
  }
  func.func @transform_2(%arg0: i32, %arg1: i32) -> (i32, i32) {
    %c0_i32 = arith.constant 0 : i32
    %c0_i32_0 = arith.constant 0 : i32
    %c0_i32_1 = arith.constant 0 : i32
    return %c0_i32, %c0_i32_0 : i32, i32
  }
  func.func @transform_3(%arg0: i32, %arg1: i32) -> (i32, i32) {
    %c0_i32 = arith.constant 0 : i32
    %c0_i32_0 = arith.constant 0 : i32
    %c0_i32_1 = arith.constant 0 : i32
    return %c0_i32, %c0_i32_0 : i32, i32
  }
  func.func @transform_4(%arg0: i32, %arg1: i32) -> (i32, i32) {
    %c0_i32 = arith.constant 0 : i32
    %c0_i32_0 = arith.constant 0 : i32
    %c0_i32_1 = arith.constant 0 : i32
    return %c0_i32, %c0_i32_0 : i32, i32
  }
  func.func @transform_5(%arg0: i32, %arg1: i32) -> (i32, i32) {
    %c0_i32 = arith.constant 0 : i32
    return %arg0, %arg1 : i32, i32
  }
}

</mosaic_0001>

<bundles_post_ra>
// kernel: tpu_custom_call.1
= control target key start
LH: loop header
LB: loop body
LE: loop exit
PB: predicated region body
PF: predicated region fallthrough
CT: control target
= control target key end

     0   :  { %6 = vsyncpa [#allocation3], 0  ;;  %s114_s0 = inlined_call_operand.hbm [shape: f32[8,128], index: 0, kind: input, shape index: {}]   ;;  %s115_s1 = inlined_call_operand.hbm [shape: f32[8,128], index: 1, kind: output, shape index: {}]  }
   0x1   :  { %7 = vsyncpa [#allocation4], 0  ;;  %s13_s8 = sshll.u32 %s114_s0, 4  ;;  %s96_s9 = smov [#allocation2]   ;;  %s14_s8 = int_to_ptr.hbm [resolvable:$true] %s13_s8 }
   0x2   :  { %s15_s10 = sshll.u32 %s96_s9, 4  ;;  %s16_s10 = int_to_ptr.vmem [resolvable:$true] %s15_s10 }
   0x3   :  { %18 = dma.hbm_to_vmem [thread:$0]  %s14_s8, 128, %s16_s10, [#allocation3]  }
   0x4   :  { %92 = dma.done.wait [#allocation3], 128  }
   0x5   :  { %93 = vsyncadd [#allocation3], 4294967168  ;;  %s97_s11 = smov [#allocation5]   ;;  %s32_s15 = sshll.u32 %s115_s1, 4  ;;  %v23_v0 = vld [vmem:[#allocation2] sm:$0xff]  ;;  %s33_s15 = int_to_ptr.hbm [resolvable:$true] %s32_s15 }
   0x6   :  { %s30_s12 = sshll.u32 %s97_s11, 4  ;;  %24 = vst [vmem:[#allocation5] sm:$0xff] %v23_v0  ;;  %s31_s12 = int_to_ptr.vmem [resolvable:$true] %s30_s12 }
   0x7   :  { %35 = dma.vmem_to_hbm [thread:$0]  %s31_s12, 128, %s33_s15, [#allocation4]  }
   0x8   :  { %94 = dma.done.wait [#allocation4], 128  }
   0x9   :  { %95 = vsyncadd [#allocation4], 4294967168 }
   0xa   :  { %40 = vsyncpa [#allocation3], 1 }
   0xb   :  { %41 = vsyncpa [#allocation4], 1 }

// kernel: tpu_custom_call.1
= control target key start
LH: loop header
LB: loop body
LE: loop exit
PB: predicated region body
PF: predicated region fallthrough
CT: control target
= control target key end

     0   :  { %s1666_s0 = inlined_call_operand.hbm [shape: f32[512,128], index: 0, kind: input, shape index: {}]   ;;  %s1667_s1 = inlined_call_operand.hbm [shape: bf16[128,128], index: 1, kind: input, shape index: {}]   ;;  %s1668_s2 = inlined_call_operand.vmem [shape: f32[1,128], index: 2, kind: input, shape index: {}]   ;;  %s1669_s3 = inlined_call_operand.hbm [shape: bf16[128,128], index: 3, kind: input, shape index: {}]   ;;  %s1670_s4 = inlined_call_operand.vmem [shape: f32[1,128], index: 4, kind: input, shape index: {}]   ;;  %s1671_s5 = inlined_call_operand.hbm [shape: f32[512,128], index: 5, kind: output, shape index: {}]  }
   0x1   :  { %1673 = sst [smem:[#allocation14_spill]] %s1667_s1 }
   0x2   :  { %1674 = sst [smem:[#allocation15_spill]] %s1669_s3 }
   0x3   :  { %10 = vsyncpa [#allocation4], 0 }
   0x4   :  { %12 = vsyncpa [#allocation4 + $0x1], 0 }
   0x5   :  { %13 = vsyncpa [#allocation7], 0 }
   0x6   :  { %14 = vsyncpa [#allocation5], 0 }
   0x7   :  { %16 = vsyncpa [#allocation5 + $0x1], 0  ;;  %s1367_s18 = smov 0   ;;  %s1369_s19 = smov 0  }
   0x8   :  { %s1371_s20 = smov 0   ;;  %s1373_s21 = smov 0  }
   0x9   :  { %s1375_s22 = smov 0   ;;  %s1377_s23 = smov 0  }
   0xa LB: > { %s856_s24 = sadd.s32 4294967295, %s1327_s23   ;;  %s857_s25 = sadd.s32 4294967294, %s1327_s23   ;;  %s1327_s23 = sphi %s1377_s23, %s22_s23   ;;  %s1323_s22 = sphi %s1375_s22, %s1690_s22   ;;  %s1319_s21 = sphi %s1373_s21, %s1689_s21   ;;  %s1315_s20 = sphi %s1371_s20, %s1688_s20   ;;  %s1311_s19 = sphi %s1369_s19, %s1687_s19   ;;  %s1307_s18 = sphi %s1367_s18, %s1686_s18  }
   0xb   : > { %p54_p0 = scmp.ne.s32.totalorder %s1311_s19, %s1307_s18  ;;  %p1401_p1 = scmp.eq.s32.totalorder %s856_s24, 0 }
   0xc   : > { %p1405_p2 = scmp.eq.s32.totalorder %s856_s24, 3  ;;  %p170_p3 = scmp.eq.s32.totalorder %s857_s25, 3 }
   0xd   : > { %p1411_p4 = por %p1401_p1, %p54_p0  ;;  %p858_p5 = scmp.ge.s32.totalorder %s1327_s23, 1 }
   0xe   : > { %p1416_p6 = por %p170_p3, %p54_p0  ;;  %p177_p7 = scmp.lt.s32.totalorder %s1327_s23, 5 }
   0xf   : > { %s1679_s1 = sld [smem:[#allocation14_spill]]  ;;  %s1329_s9 = smov [#allocation6]  }
  0x10   : > { %p1424_p8 = pnand %p858_p5, %p177_p7  ;;  %s190_s10 = sshll.u32 %s1329_s9, 4  ;;  %s191_s10 = int_to_ptr.vmem [resolvable:$true] %s190_s10 }
  0x11   : > { %s1681_s3 = sld [smem:[#allocation15_spill]]  ;;  %s1330_s14 = smov 64  }
  0x12   : > { %p1072_p9 = pneg %p1424_p8  ;;  %s1331_s15 = smov 4  }
  0x13   : > { %s1332_s16 = smov [#allocation8]   ;;  %s34_s24 = sadd.s32 1, %s1323_s22 }
  0x14   : > { %p1073_p10 = pnand %p1072_p9, %p1401_p1  ;;  %s207_s17 = sshll.u32 %s1332_s16, 4  ;;  %s208_s17 = int_to_ptr.vmem [resolvable:$true] %s207_s17 }
  0x15   : > { %s188_s7 = sshll.u32 %s1679_s1, 4  ;;  %s41_s25 = sadd.s32 1, %s1315_s20  ;;  %s189_s7 = int_to_ptr.hbm [resolvable:$true] %s188_s7 }
  0x16   : > { %1075 = dma.hbm_to_vmem [thread:$0]  (!%p1073_p10), %s189_s7, 1024, %s191_s10, [#allocation7], %s1330_s14, %s1330_s14, %s1331_s15  }
  0x17   : > { %s205_s13 = sshll.u32 %s1681_s3, 4  ;;  %p36_p11 = scmp.ge.s32.totalorder %s34_s24, 4  ;;  %s206_s13 = int_to_ptr.hbm [resolvable:$true] %s205_s13 }
  0x18   : > { %1078 = dma.hbm_to_vmem [thread:$0]  (!%p1073_p10), %s206_s13, 1024, %s208_s17, [#allocation7], %s1330_s14, %s1330_s14, %s1331_s15  }
  0x19   : > { %p48_p12 = scmp.ne.s32.totalorder %s1315_s20, %s1311_s19  ;;  %p49_p13 = scmp.eq.s32.totalorder %s1327_s23, 0 }
  0x1a   : > { %p1089_p0 = scmp.lt.s32.totalorder %s1327_s23, 4  ;;  %s1692_s24 = smov (%p36_p11, %s34_s24), 0 }
  0x1b   : > { %1682 = sst [smem:[#allocation13_spill]] %s1692_s24  ;;  %p1443_p3 = por %p49_p13, %p48_p12 }
  0x1c   : > { %p1449_p5 = por %p1405_p2, %p48_p12  ;;  %s38_s7 = ssub.s32 %s1323_s22, %s1692_s24 }
  0x1d   : > { %s224_s9 = sand.u32 1, %s1315_s20   ;;  %p39_p7 = scmp.eq.s32.totalorder %s38_s7, 0 }
  0x1e   : > { %s862_s10 = sshll.u32 %s224_s9, 7  ;;  %s971_s11 = sshll.u32 %s1323_s22, 7 }
  0x1f   : > { %s1458_s12 = scalar_select %p39_p7, %s1315_s20, %s41_s25  }
  0x20   : > { %s233_s15 = scalar_lea.hbm %s1666_s0, %s971_s11  ;;  %s228_s17 = scalar_lea.vmem [#allocation3], %s862_s10 }
  0x21   : > { %s234_s16 = sshll.u32 %s233_s15, 4  ;;  %s236_s1 = sshll.u32 %s228_s17, 4  ;;  %s235_s16 = int_to_ptr.hbm [resolvable:$true] %s234_s16  ;;  %s237_s1 = int_to_ptr.vmem [resolvable:$true] %s236_s1 }
  0x22   : > { %p1080_p2 = pnand %p1089_p0, %p1443_p3  ;;  %s225_s27 = scalar_lea.sflag [#allocation4], %s224_s9 }
  0x23   : > { %s1333_s3 = smov 128   ;;  %s1334_s24 = smov 8  }
  0x24   : > { %1082 = dma.hbm_to_vmem [thread:$0]  (!%p1080_p2), %s235_s16, 2048, %s237_s1, %s225_s27, %s1333_s3, %s1333_s3, %s1334_s24  }
  0x25   : > { %248 = sbr.rel (%p1424_p8) target bundleno = 429 (0x1ad), region = 40  ;;  %s1470_s25 = sand.u32 (!%p1424_p8), 1, %s1311_s19  }
  0x26   : > { %s866_s7 = sshll.u32 (!%p1424_p8), %s1470_s25, 7  ;;  %s251_s10 = scalar_lea.sflag (!%p1424_p8), [#allocation4], %s1470_s25 }
  0x27   : > { %s1476_s30 = scalar_lea.vmem (!%p1424_p8), [#allocation3], %s866_s7 }
  0x2a   : > { %1294 = dma.done.wait (%p1411_p4), %s251_s10, 2048  }
  0x2b   : > { %1296 = vsyncadd (%p1411_p4), %s251_s10, 4294965248 }
  0x2c   : > { %1298 = dma.done.wait (%p1401_p1), [#allocation7], 2048  }
  0x2d   : > { %1300 = vsyncadd (%p1401_p1), [#allocation7], 4294965248  ;;  %v979_v0 = vld [vmem:[#allocation6 + $0x38] sm:$0xff]  ;;  %v978_v1 = vld [vmem:[#allocation6 + $0x30] sm:$0xff]  ;;  %s1580_s8 = scalar_lea.vmem [#allocation9], %s866_s7  ;;  %s996_s24 = sshll.u32 %s1319_s21, 7 }
  0x2e   : > { %390 = vmatpush.bf16.msra.mxu0 %v979_v0  ;;  %1044 = vmatpush.bf16.msra.mxu2 %v979_v0  ;;  %v977_v2 = vld [vmem:[#allocation6 + $0x28] sm:$0xff]  ;;  %v976_v3 = vld [vmem:[#allocation6 + $0x20] sm:$0xff]  ;;  %v975_v4 = vld [vmem:[#allocation6 + $0x18] sm:$0xff]  ;;  %s749_s13 = scalar_lea.hbm %s1671_s5, %s996_s24  ;;  %s750_s14 = sshll.u32 %s1580_s8, 4  ;;  %s751_s14 = int_to_ptr.vmem [resolvable:$true] %s750_s14 }
  0x2f   : > { %v974_v5 = vld [vmem:[#allocation6 + $0x10] sm:$0xff]  ;;  %v973_v6 = vld [vmem:[#allocation6 + $0x8] sm:$0xff]  ;;  %v972_v7 = vld [vmem:[#allocation6] sm:$0xff]  ;;  %s752_s15 = sshll.u32 %s749_s13, 4  ;;  %s737_s21 = scalar_lea.sflag [#allocation5], %s1470_s25  ;;  %s753_s15 = int_to_ptr.hbm [resolvable:$true] %s752_s15 }
  0x30   : > { %v1487_v8 = vld [vmem:[%s1476_s30] sm:$0xff]  ;;  %v1490_v9 = vld [vmem:[%s1476_s30 + $0x8] sm:$0xff]  ;;  %v1503_v14 = vld [vmem:[%s1476_s30 + $0x10] sm:$0xff]  ;;  %s1255_s16 = sshra.s32 %s753_s15, 4  ;;  %s1261_s10 = scalar_lea.hbm %s1671_s5, 512  ;;  %s1256_s16 = int_to_ptr.hbm [resolvable:$true] %s1255_s16 }
  0x31   : > { %v1493_v10 = vld [vmem:[%s1476_s30 + $0x40] sm:$0xff]  ;;  %v1496_v11 = vld [vmem:[%s1476_s30 + $0x48] sm:$0xff]  ;;  %v314_v12 = vpack.c.bf16 %v1490_v9, %v1487_v8  ;;  %v1506_v15 = vld [vmem:[%s1476_s30 + $0x18] sm:$0xff]  ;;  %s1257_s17 = scalar_lea.hbm %s1256_s16, 128  ;;  %p1262_p9 = scmp.lt.s32.totalorder %s1256_s16, %s1671_s5 }
  0x32   : > { %391 = vmatpush.bf16.msra.mxu0 %v978_v1  ;;  %1045 = vmatpush.bf16.msra.mxu2 %v978_v1  ;;  %v318_v13 = vpack.c.bf16 %v1496_v11, %v1493_v10  ;;  %v1509_v16 = vld [vmem:[%s1476_s30 + $0x50] sm:$0xff]  ;;  %v1512_v17 = vld [vmem:[%s1476_s30 + $0x58] sm:$0xff]  ;;  %v315_v18 = vpack.c.bf16 %v1506_v15, %v1503_v14  ;;  %v1519_v22 = vld [vmem:[%s1476_s30 + $0x20] sm:$0xff]  ;;  %p1258_p1 = scmp.ne.s32.totalorder %s1256_s16, %s1257_s17  ;;  %p1263_p10 = scmp.lt.s32.totalorder %s1261_s10, %s1257_s17 }
  0x33   : > { %v319_v19 = vpack.c.bf16 %v1512_v17, %v1509_v16  ;;  %v995_v20 = vld [vmem:[#allocation8 + $0x38] sm:$0xff]  ;;  %v994_v21 = vld [vmem:[#allocation8 + $0x30] sm:$0xff]  ;;  %v1522_v23 = vld [vmem:[%s1476_s30 + $0x28] sm:$0xff] }
  0x34   : > { %619 = vmatpush.bf16.msra.mxu1 %v995_v20  ;;  %1052 = vmatpush.bf16.msra.mxu3 %v995_v20  ;;  %v1525_v24 = vld [vmem:[%s1476_s30 + $0x60] sm:$0xff]  ;;  %v1528_v25 = vld [vmem:[%s1476_s30 + $0x68] sm:$0xff]  ;;  %v316_v26 = vpack.c.bf16 %v1522_v23, %v1519_v22  ;;  %v1535_v28 = vld [vmem:[%s1476_s30 + $0x30] sm:$0xff]  ;;  %p1259_p4 = pnand %p1258_p1, %p1449_p5  ;;  %p1264_p11 = por %p1263_p10, %p1262_p9 }
  0x35   : > { %v320_v27 = vpack.c.bf16 %v1528_v25, %v1525_v24  ;;  %v1538_v29 = vld [vmem:[%s1476_s30 + $0x38] sm:$0xff]  ;;  %v1541_v30 = vld [vmem:[%s1476_s30 + $0x70] sm:$0xff]  ;;  %v993_v34 = vld [vmem:[#allocation8 + $0x28] sm:$0xff] }
  0x36   : > { %392 = vmatpush.bf16.msra.mxu0 %v977_v2  ;;  %1046 = vmatpush.bf16.msra.mxu2 %v977_v2  ;;  %v1544_v31 = vld [vmem:[%s1476_s30 + $0x78] sm:$0xff]  ;;  %v317_v32 = vpack.c.bf16 %v1538_v29, %v1535_v28  ;;  %v992_v35 = vld [vmem:[#allocation8 + $0x20] sm:$0xff]  ;;  %v990_v37 = vld [vmem:[#allocation8 + $0x10] sm:$0xff]  ;;  %p1260_p8 = pneg %p1259_p4 }
  0x37   : > { %v321_v33 = vpack.c.bf16 %v1544_v31, %v1541_v30  ;;  %v991_v36 = vld [vmem:[#allocation8 + $0x18] sm:$0xff]  ;;  %v989_v38 = vld [vmem:[#allocation8 + $0x8] sm:$0xff]  ;;  %v988_v39 = vld [vmem:[#allocation8] sm:$0xff] }
  0x38   : > { %620 = vmatpush.bf16.msra.mxu1 %v994_v21  ;;  %1053 = vmatpush.bf16.msra.mxu3 %v994_v21  ;;  %v1553_v41 = vld [vmem:[%s1668_s2] ss:$0 sm:$0xff]  ;;  %p1265_p12 = pnand %p1264_p11, %p1260_p8 }
  0x3a   : > { %393 = vmatpush.bf16.msra.mxu0 %v976_v3  ;;  %1047 = vmatpush.bf16.msra.mxu2 %v976_v3 }
  0x3c   : > { %621 = vmatpush.bf16.msra.mxu1 %v993_v34  ;;  %1054 = vmatpush.bf16.msra.mxu3 %v993_v34 }
  0x3e   : > { %394 = vmatpush.bf16.msra.mxu0 %v975_v4  ;;  %1048 = vmatpush.bf16.msra.mxu2 %v975_v4 }
  0x40   : > { %622 = vmatpush.bf16.msra.mxu1 %v992_v35  ;;  %1055 = vmatpush.bf16.msra.mxu3 %v992_v35 }
  0x42   : > { %395 = vmatpush.bf16.msra.mxu0 %v974_v5  ;;  %1049 = vmatpush.bf16.msra.mxu2 %v974_v5 }
  0x44   : > { %623 = vmatpush.bf16.msra.mxu1 %v991_v36  ;;  %1056 = vmatpush.bf16.msra.mxu3 %v991_v36 }
  0x46   : > { %396 = vmatpush.bf16.msra.mxu0 %v973_v6  ;;  %1050 = vmatpush.bf16.msra.mxu2 %v973_v6 }
  0x48   : > { %624 = vmatpush.bf16.msra.mxu1 %v990_v37  ;;  %1057 = vmatpush.bf16.msra.mxu3 %v990_v37 }
  0x4a   : > { %397 = vmatpush.bf16.msra.mxu0 %v972_v7  ;;  %1051 = vmatpush.bf16.msra.mxu2 %v972_v7 }
  0x4c   : > { %625 = vmatpush.bf16.msra.mxu1 %v989_v38  ;;  %1058 = vmatpush.bf16.msra.mxu3 %v989_v38 }
  0x4d   : > { %398 = vmatmul.bf16.vlgmr.msra.gmra.mxu0 %v314_v12  ;;  %418 = vmatmul.bf16.vlgmr.msra.gmra.mxu2 %v318_v13 }
  0x50   : > { %626 = vmatpush.bf16.msra.mxu1 %v988_v39  ;;  %1059 = vmatpush.bf16.msra.mxu3 %v988_v39 }
  0x5d   : > { %403 = vmatmul.bf16.gmra.mxu0 %v315_v18  ;;  %423 = vmatmul.bf16.gmra.mxu2 %v319_v19 }
  0x6d   : > { %408 = vmatmul.bf16.gmra.mxu0 %v316_v26  ;;  %428 = vmatmul.bf16.gmra.mxu2 %v320_v27 }
  0x7d   : > { %413 = vmatmul.bf16.gmra.mxu0 %v317_v32  ;;  %433 = vmatmul.bf16.gmra.mxu2 %v321_v33 }
  0xca   : > { %v399_v40 = vpop.f32.mrf.mxu0 }
  0xcb   : > { %v400_v42 = vadd.f32 %v1553_v41, %v399_v40 }
  0xcd   : > { %v439_v45 = vmax.f32 %v400_v42, 0.0 }
  0xd0   : > { %v419_v43 = vpop.f32.mrf.mxu2 }
  0xd1   : > { %v420_v48 = vadd.f32 %v1553_v41, %v419_v43 }
  0xd2   : > { %v401_v44 = vpop.f32.mrf.mxu0 }
  0xd3   : > { %v402_v46 = vadd.f32 %v1553_v41, %v401_v44  ;;  %v447_v53 = vmax.f32 %v420_v48, 0.0 }
  0xd5   : > { %v440_v47 = vmax.f32 %v402_v46, 0.0 }
  0xd7   : > { %v1000_v49 = vpack.c.bf16 %v440_v47, %v439_v45 }
  0xd8   : > { %v421_v50 = vpop.f32.mrf.mxu2 }
  0xd9   : > { %1001 = vst [vmem:[#allocation2 + $0x30] sm:$0xff] %v1000_v49   ;;  %v422_v51 = vadd.f32 %v1553_v41, %v421_v50 }
  0xda   : > { %v404_v52 = vpop.f32.mrf.mxu0 }
  0xdb   : > { %v448_v54 = vmax.f32 %v422_v51, 0.0  ;;  %v405_v56 = vadd.f32 %v1553_v41, %v404_v52 }
  0xdd   : > { %v1020_v55 = vpack.c.bf16 %v448_v54, %v447_v53  ;;  %v441_v60 = vmax.f32 %v405_v56, 0.0 }
  0xdf   : > { %1040 = vst [vmem:[#allocation2 + $0x8] sm:$0xff] %v1020_v55  }
  0xe0   : > { %v424_v57 = vpop.f32.mrf.mxu2  ;;  %v980_v58 = vld [vmem:[#allocation2 + $0x30] sm:$0xff] }
  0xe1   : > { %627 = vmatmul.bf16.vlgmr.msra.gmra.mxu1 %v980_v58  ;;  %v425_v0 = vadd.f32 %v1553_v41, %v424_v57  ;;  %v1574_v58 = vld [vmem:[%s1670_s4] ss:$0 sm:$0xff] }
  0xe2   : > { %v406_v59 = vpop.f32.mrf.mxu0 }
  0xe3   : > { %v407_v61 = vadd.f32 %v1553_v41, %v406_v59  ;;  %v449_v5 = vmax.f32 %v425_v0, 0.0 }
  0xe5   : > { %v442_v62 = vmax.f32 %v407_v61, 0.0 }
  0xe6   : > { %v984_v63 = vld [vmem:[#allocation2 + $0x8] sm:$0xff] }
  0xe7   : > { %v1005_v1 = vpack.c.bf16 %v442_v62, %v441_v60  ;;  %647 = vmatmul.bf16.vlgmr.msra.gmra.mxu3 %v984_v63 }
  0xe8   : > { %v426_v2 = vpop.f32.mrf.mxu2 }
  0xe9   : > { %1037 = vst [vmem:[#allocation2] sm:$0xff] %v1005_v1   ;;  %v427_v3 = vadd.f32 %v1553_v41, %v426_v2 }
  0xea   : > { %v409_v4 = vpop.f32.mrf.mxu0 }
  0xeb   : > { %v450_v6 = vmax.f32 %v427_v3, 0.0  ;;  %v410_v12 = vadd.f32 %v1553_v41, %v409_v4 }
  0xed   : > { %v1025_v7 = vpack.c.bf16 %v450_v6, %v449_v5  ;;  %v443_v20 = vmax.f32 %v410_v12, 0.0 }
  0xef   : > { %1041 = vst [vmem:[#allocation2 + $0x20] sm:$0xff] %v1025_v7  }
  0xf0   : > { %v429_v13 = vpop.f32.mrf.mxu2  ;;  %v981_v18 = vld [vmem:[#allocation2] sm:$0xff] }
  0xf1   : > { %632 = vmatmul.bf16.gmra.mxu1 %v981_v18  ;;  %v430_v32 = vadd.f32 %v1553_v41, %v429_v13 }
  0xf2   : > { %v411_v19 = vpop.f32.mrf.mxu0 }
  0xf3   : > { %v412_v21 = vadd.f32 %v1553_v41, %v411_v19  ;;  %v451_v37 = vmax.f32 %v430_v32, 0.0 }
  0xf5   : > { %v444_v26 = vmax.f32 %v412_v21, 0.0 }
  0xf6   : > { %v985_v27 = vld [vmem:[#allocation2 + $0x20] sm:$0xff] }
  0xf7   : > { %v1010_v33 = vpack.c.bf16 %v444_v26, %v443_v20  ;;  %652 = vmatmul.bf16.gmra.mxu3 %v985_v27 }
  0xf8   : > { %v431_v34 = vpop.f32.mrf.mxu2 }
  0xf9   : > { %1038 = vst [vmem:[#allocation2 + $0x18] sm:$0xff] %v1010_v33   ;;  %v432_v35 = vadd.f32 %v1553_v41, %v431_v34 }
  0xfa   : > { %v414_v36 = vpop.f32.mrf.mxu0 }
  0xfb   : > { %v452_v38 = vmax.f32 %v432_v35, 0.0  ;;  %v415_v40 = vadd.f32 %v1553_v41, %v414_v36 }
  0xfd   : > { %v1030_v39 = vpack.c.bf16 %v452_v38, %v451_v37  ;;  %v445_v45 = vmax.f32 %v415_v40, 0.0 }
  0xff   : > { %1042 = vst [vmem:[#allocation2 + $0x28] sm:$0xff] %v1030_v39  }
 0x100   : > { %v434_v42 = vpop.f32.mrf.mxu2  ;;  %v982_v43 = vld [vmem:[#allocation2 + $0x18] sm:$0xff] }
 0x101   : > { %637 = vmatmul.bf16.gmra.mxu1 %v982_v43  ;;  %v435_v49 = vadd.f32 %v1553_v41, %v434_v42 }
 0x102   : > { %v416_v44 = vpop.f32.mrf.mxu0 }
 0x103   : > { %v417_v46 = vadd.f32 %v1553_v41, %v416_v44  ;;  %v453_v53 = vmax.f32 %v435_v49, 0.0 }
 0x105   : > { %v446_v47 = vmax.f32 %v417_v46, 0.0 }
 0x106   : > { %v986_v48 = vld [vmem:[#allocation2 + $0x28] sm:$0xff] }
 0x107   : > { %v1015_v50 = vpack.c.bf16 %v446_v47, %v445_v45  ;;  %657 = vmatmul.bf16.gmra.mxu3 %v986_v48 }
 0x108   : > { %v436_v51 = vpop.f32.mrf.mxu2 }
 0x109   : > { %1039 = vst [vmem:[#allocation2 + $0x10] sm:$0xff] %v1015_v50   ;;  %v437_v52 = vadd.f32 %v1553_v41, %v436_v51 }
 0x10b   : > { %v454_v54 = vmax.f32 %v437_v52, 0.0 }
 0x10d   : > { %v1035_v55 = vpack.c.bf16 %v454_v54, %v453_v53 }
 0x10f   : > { %1043 = vst [vmem:[#allocation2 + $0x38] sm:$0xff] %v1035_v55  }
 0x110   : > { %v983_v56 = vld [vmem:[#allocation2 + $0x10] sm:$0xff] }
 0x111   : > { %642 = vmatmul.bf16.gmra.mxu1 %v983_v56 }
 0x116   : > { %v987_v57 = vld [vmem:[#allocation2 + $0x38] sm:$0xff] }
 0x117   : > { %662 = vmatmul.bf16.gmra.mxu3 %v987_v57 }
 0x15e   : > { %v628_v59 = vpop.f32.mrf.mxu1 }
 0x15f   : > { %v629_v60 = vadd.f32 %v1574_v58, %v628_v59 }
 0x161   : > { %v668_v61 = vmax.f32 %v629_v60, 0.0 }
 0x163   : > { %v704_v62 = vadd.f32 %v668_v61, %v1487_v8 }
 0x165   : > { %720 = vst [vmem:[%s1580_s8] sm:$0xff] %v704_v62 }
 0x166   : > { %v630_v41 = vpop.f32.mrf.mxu1 }
 0x167   : > { %v631_v63 = vadd.f32 %v1574_v58, %v630_v41 }
 0x169   : > { %v669_v0 = vmax.f32 %v631_v63, 0.0 }
 0x16a   : > { %v648_v1 = vpop.f32.mrf.mxu3 }
 0x16b   : > { %v705_v2 = vadd.f32 %v669_v0, %v1490_v9  ;;  %v649_v3 = vadd.f32 %v1574_v58, %v648_v1 }
 0x16d   : > { %721 = vst [vmem:[%s1580_s8 + $0x8] sm:$0xff] %v705_v2  ;;  %v676_v8 = vmax.f32 %v649_v3, 0.0 }
 0x16e   : > { %v633_v4 = vpop.f32.mrf.mxu1 }
 0x16f   : > { %v712_v5 = vadd.f32 %v676_v8, %v1493_v10  ;;  %v634_v6 = vadd.f32 %v1574_v58, %v633_v4 }
 0x171   : > { %728 = vst [vmem:[%s1580_s8 + $0x40] sm:$0xff] %v712_v5  ;;  %v670_v7 = vmax.f32 %v634_v6, 0.0 }
 0x172   : > { %v650_v12 = vpop.f32.mrf.mxu3 }
 0x173   : > { %v706_v13 = vadd.f32 %v670_v7, %v1503_v14  ;;  %v651_v18 = vadd.f32 %v1574_v58, %v650_v12 }
 0x175   : > { %722 = vst [vmem:[%s1580_s8 + $0x10] sm:$0xff] %v706_v13  ;;  %v677_v9 = vmax.f32 %v651_v18, 0.0 }
 0x176   : > { %v635_v19 = vpop.f32.mrf.mxu1 }
 0x177   : > { %v713_v20 = vadd.f32 %v677_v9, %v1496_v11  ;;  %v636_v21 = vadd.f32 %v1574_v58, %v635_v19 }
 0x179   : > { %729 = vst [vmem:[%s1580_s8 + $0x48] sm:$0xff] %v713_v20  ;;  %v671_v10 = vmax.f32 %v636_v21, 0.0 }
 0x17a   : > { %v653_v26 = vpop.f32.mrf.mxu3 }
 0x17b   : > { %v707_v27 = vadd.f32 %v671_v10, %v1506_v15  ;;  %v654_v32 = vadd.f32 %v1574_v58, %v653_v26 }
 0x17d   : > { %723 = vst [vmem:[%s1580_s8 + $0x18] sm:$0xff] %v707_v27  ;;  %v678_v14 = vmax.f32 %v654_v32, 0.0 }
 0x17e   : > { %v638_v33 = vpop.f32.mrf.mxu1 }
 0x17f   : > { %v714_v34 = vadd.f32 %v678_v14, %v1509_v16  ;;  %v639_v35 = vadd.f32 %v1574_v58, %v638_v33 }
 0x181   : > { %730 = vst [vmem:[%s1580_s8 + $0x50] sm:$0xff] %v714_v34  ;;  %v672_v11 = vmax.f32 %v639_v35, 0.0 }
 0x182   : > { %v655_v36 = vpop.f32.mrf.mxu3 }
 0x183   : > { %v708_v37 = vadd.f32 %v672_v11, %v1519_v22  ;;  %v656_v38 = vadd.f32 %v1574_v58, %v655_v36 }
 0x185   : > { %724 = vst [vmem:[%s1580_s8 + $0x20] sm:$0xff] %v708_v37  ;;  %v679_v15 = vmax.f32 %v656_v38, 0.0 }
 0x186   : > { %v640_v39 = vpop.f32.mrf.mxu1 }
 0x187   : > { %v715_v40 = vadd.f32 %v679_v15, %v1512_v17  ;;  %v641_v42 = vadd.f32 %v1574_v58, %v640_v39 }
 0x189   : > { %731 = vst [vmem:[%s1580_s8 + $0x58] sm:$0xff] %v715_v40  ;;  %v673_v16 = vmax.f32 %v641_v42, 0.0 }
 0x18a   : > { %v658_v43 = vpop.f32.mrf.mxu3 }
 0x18b   : > { %v709_v44 = vadd.f32 %v673_v16, %v1522_v23  ;;  %v659_v45 = vadd.f32 %v1574_v58, %v658_v43 }
 0x18d   : > { %725 = vst [vmem:[%s1580_s8 + $0x28] sm:$0xff] %v709_v44  ;;  %v680_v22 = vmax.f32 %v659_v45, 0.0 }
 0x18e   : > { %v643_v46 = vpop.f32.mrf.mxu1 }
 0x18f   : > { %v716_v47 = vadd.f32 %v680_v22, %v1525_v24  ;;  %v644_v48 = vadd.f32 %v1574_v58, %v643_v46 }
 0x191   : > { %732 = vst [vmem:[%s1580_s8 + $0x60] sm:$0xff] %v716_v47  ;;  %v674_v17 = vmax.f32 %v644_v48, 0.0 }
 0x192   : > { %v660_v49 = vpop.f32.mrf.mxu3 }
 0x193   : > { %v710_v50 = vadd.f32 %v674_v17, %v1535_v28  ;;  %v661_v51 = vadd.f32 %v1574_v58, %v660_v49 }
 0x195   : > { %726 = vst [vmem:[%s1580_s8 + $0x30] sm:$0xff] %v710_v50  ;;  %v681_v23 = vmax.f32 %v661_v51, 0.0 }
 0x196   : > { %v645_v52 = vpop.f32.mrf.mxu1 }
 0x197   : > { %v717_v53 = vadd.f32 %v681_v23, %v1528_v25  ;;  %v646_v24 = vadd.f32 %v1574_v58, %v645_v52 }
 0x199   : > { %733 = vst [vmem:[%s1580_s8 + $0x68] sm:$0xff] %v717_v53  ;;  %v675_v54 = vmax.f32 %v646_v24, 0.0 }
 0x19a   : > { %v663_v55 = vpop.f32.mrf.mxu3 }
 0x19b   : > { %v711_v56 = vadd.f32 %v675_v54, %v1538_v29  ;;  %v664_v57 = vadd.f32 %v1574_v58, %v663_v55 }
 0x19d   : > { %727 = vst [vmem:[%s1580_s8 + $0x38] sm:$0xff] %v711_v56  ;;  %v682_v28 = vmax.f32 %v664_v57, 0.0 }
 0x19f   : > { %v718_v59 = vadd.f32 %v682_v28, %v1541_v30 }
 0x1a1   : > { %734 = vst [vmem:[%s1580_s8 + $0x70] sm:$0xff] %v718_v59 }
 0x1a2   : > { %v665_v25 = vpop.f32.mrf.mxu3 }
 0x1a3   : > { %v666_v60 = vadd.f32 %v1574_v58, %v665_v25 }
 0x1a5   : > { %v683_v29 = vmax.f32 %v666_v60, 0.0 }
 0x1a7   : > { %v719_v61 = vadd.f32 %v683_v29, %v1544_v31 }
 0x1a9   : > { %735 = vst [vmem:[%s1580_s8 + $0x78] sm:$0xff] %v719_v61 }
 0x1aa   : > { %1268 = shalt.err (!%p1265_p12)
}
 0x1ab   : > { %s1335_s25 = smov 128   ;;  %s1336_s3 = smov 8  }
 0x1ac   : > { %1070 = dma.vmem_to_hbm [thread:$0]  (%p1449_p5), %s751_s14, 2048, %s753_s15, %s737_s21, %s1335_s25, %s1335_s25, %s1336_s3  }
 0x1ad PF: > { %p1092_p13 = scmp.ge.s32.totalorder %s1327_s23, 2  ;;  %s767_s26 = sand.u32 1, %s1307_s18  }
 0x1ae   : > { %s768_s28 = scalar_lea.sflag [#allocation5], %s767_s26 }
 0x1af   : > { %p1084_p0 = pnand %p1092_p13, %p1416_p6 }
 0x1b1   : > { %p1085_p3 = pneg %p1084_p0 }
 0x1b3   : > { %1302 = dma.done.wait (%p1085_p3), %s768_s28, 2048  }
 0x1b4   : > { %1304 = vsyncadd (%p1085_p3), %s768_s28, 4294965248  ;;  %s22_s23 = sadd.s32 1, %s1327_s23   ;;  %s1685_s6 = sld [smem:[#allocation13_spill]] }
 0x1b5   : > { %p19_p7 = scmp.ge.s32.totalorder %s22_s23, 6   ;;  %s1686_s18 = smov %s1311_s19 }
 0x1b6   : > { %s1687_s19 = smov %s1315_s20  ;;  %s1688_s20 = smov %s1458_s12 }
 0x1b7   : > { %s1689_s21 = smov %s1323_s22  ;;  %21 = sbr.rel (!%p19_p7) target bundleno = 10 (0xa), region = 98 }
 0x1ba   : > { %s1690_s22 = smov %s1685_s6 }
 0x1bc   :  { %774 = vsyncpa [#allocation4], 1 }
 0x1bd   :  { %776 = vsyncpa [#allocation4 + $0x1], 1 }
 0x1be   :  { %777 = vsyncpa [#allocation7], 1 }
 0x1bf   :  { %778 = vsyncpa [#allocation5], 1 }
 0x1c0   :  { %780 = vsyncpa [#allocation5 + $0x1], 1 }

</bundles_post_ra>
